<compile_context>
chip_gen: v7x
topology: tpu7x:2x2x1
jax: 0.10.0
libtpu: 0.0.40
codegen_flags: <defaults>
</compile_context>

<pallas_src>
import functools
import math

import jax
import jax.numpy as jnp
from jax.experimental import pallas as pl
from jax.experimental.pallas import tpu as pltpu


def _sigmoid(z):
    # sigmoid(z) = 0.5 * (tanh(z/2) + 1)  -> EUP transcendental, no VPU divide.
    return 0.5 * (jnp.tanh(0.5 * z) + 1.0)


def _primitives_kernel(sp_ref, vp_ref, stb_ref, stf_ref, pa_ref, pb_ref, out_ref,
                       *, NL1, NL2, N, NMV, NWC):
    # Scalar params (SMEM): BallTouched alpha, 1/exp(beta).
    a_bt = sp_ref[0]
    ieb_bt = sp_ref[1]

    # ---- Predicate 1: BallTouched = SoftLarge(||Diff_ks3(Diff_ks4s3(ball))||) ----
    stb = stb_ref[...]                                   # [D, TB, NL1+1] (ball, time on lanes)
    d1b = stb[:, :, 0:NL1] - stb[:, :, 1:NL1 + 1]        # [D, TB, NL1]
    d2 = d1b[:, :, 0:NL2] - d1b[:, :, 2:2 + NL2]         # [D, TB, NL2]
    acc = jnp.sqrt(jnp.sum(d2 * d2, axis=0))             # [TB, NL2] (leading-axis reduce)
    out_ref[:, 0:NL2] = _sigmoid((acc - a_bt) * ieb_bt)

    # ---- Predicate 2: Moving = SoftLarge(||Diff_ks4s3||_{xy}), lane-flat (t,agent) ----
    stf = stf_ref[...]                                   # [D, TB, (NL1+1)*N]
    d1f = stf[:, :, 0:NMV] - stf[:, :, N:N + NMV]        # [D, TB, NL1*N]
    speed = jnp.sqrt(d1f[0] * d1f[0] + d1f[1] * d1f[1])  # [TB, NL1*N] (xy dims only)
    out_ref[:, NL2:NL2 + NMV] = _sigmoid(
        (speed - vp_ref[0:1, 0:NMV]) * vp_ref[1:2, 0:NMV])

    # ---- Predicates 3+4: WithBall + Close = SoftSmall(pair distance), lane-flat ----
    dif = pa_ref[...] - pb_ref[...]                      # [D, TB, NWC]
    dist = jnp.sqrt(jnp.sum(dif * dif, axis=0))          # [TB, NWC]
    out_ref[:, NL2 + NMV:] = _sigmoid(
        (vp_ref[2:3, :] - dist) * vp_ref[3:4, :])


def primitives_pallas(states, params, tb=None):
    B, L, N, D = states.shape
    NL1 = (L - 2 - 4 + 1) // 3        # Differential(ks=4, stride=3, padding=-1)
    NL2 = NL1 - 2                     # Differential(ks=3, stride=1, padding=0)
    NMV = NL1 * N                     # Moving features per batch
    NPAIR = (N - 1) * (N - 2) // 2    # Close pairs (66)
    NWB = L * (N - 1)                 # WithBall features per batch
    NWC = NWB + L * NPAIR             # merged WithBall+Close lane width (1326)
    OUTW = NL2 + NMV + NWC            # == module feature_length

    # ---- Wrapper-side layout plumbing (state_dim leading, everything lane-flat) ----
    xt = jnp.transpose(states, (3, 0, 1, 2)).astype(jnp.float32)      # [D, B, L, N]
    sub = xt[:, :, 1:2 + 3 * NL1:3, :]                    # rows 1,4,7,10,13 -> [D,B,NL1+1,N]
    stb = sub[:, :, :, 0]                                 # ball series     [D, B, NL1+1]
    stf = sub.reshape(D, B, (NL1 + 1) * N)                # (t,agent) flat  [D, B, 65]

    # Pair slabs: first the 12 WithBall pairs (player, ball), then the 66 Close pairs,
    # both time-major, matching the module's final concat order exactly.
    p1_idx = jnp.array([p1 for p1 in range(1, N - 1) for p2 in range(p1 + 1, N)],
                       dtype=jnp.int32)
    p2_idx = jnp.array([p2 for p1 in range(1, N - 1) for p2 in range(p1 + 1, N)],
                       dtype=jnp.int32)
    wb_a = xt[:, :, :, 1:].reshape(D, B, NWB)
    wb_b = jnp.broadcast_to(xt[:, :, :, 0:1], (D, B, L, N - 1)).reshape(D, B, NWB)
    cl_a = jnp.take(xt, p1_idx, axis=3).reshape(D, B, L * NPAIR)
    cl_b = jnp.take(xt, p2_idx, axis=3).reshape(D, B, L * NPAIR)
    pa = jnp.concatenate([wb_a, cl_a], axis=2)            # [D, B, NWC]
    pb = jnp.concatenate([wb_b, cl_b], axis=2)            # [D, B, NWC]

    # ---- Hoisted per-lane SoftCompare parameters (alpha, 1/exp(beta)) ----
    params = params.astype(jnp.float32)
    a_mb, ieb_mb, a_mp, ieb_mp = params[2], params[3], params[4], params[5]
    a_wb, ieb_wb, a_cl, ieb_cl = params[6], params[7], params[8], params[9]
    agent = jnp.arange(NMV, dtype=jnp.int32) % N
    mv_alpha = jnp.where(agent == 0, a_mb, a_mp)
    mv_invb = jnp.where(agent == 0, ieb_mb, ieb_mp)
    wc_alpha = jnp.concatenate([jnp.full((NWB,), a_wb, jnp.float32),
                                jnp.full((L * NPAIR,), a_cl, jnp.float32)])
    wc_invb = jnp.concatenate([jnp.full((NWB,), ieb_wb, jnp.float32),
                               jnp.full((L * NPAIR,), ieb_cl, jnp.float32)])
    pad = NWC - NMV
    vparams = jnp.stack([jnp.pad(mv_alpha, (0, pad)), jnp.pad(mv_invb, (0, pad)),
                         wc_alpha, wc_invb], axis=0)      # [4, NWC], VMEM-resident

    # ---- Batch blocking ----
    if tb is None:
        # Tiny batches: one step.  Larger batches: TB multiple of 8, grid >= 2 so
        # dimension_semantics=("parallel",) still shards across v7x's 2 TensorCores.
        tb = B if B <= 8 else min(64, max(8, (B // 2) // 8 * 8))
    grid = (pl.cdiv(B, tb),)

    kern = functools.partial(_primitives_kernel, NL1=NL1, NL2=NL2, N=N,
                             NMV=NMV, NWC=NWC)
    out = pl.pallas_call(
        kern,
        out_shape=jax.ShapeDtypeStruct((B, OUTW), jnp.float32),
        grid=grid,
        in_specs=[
            pl.BlockSpec(memory_space=pltpu.MemorySpace.SMEM),           # scalar params
            pl.BlockSpec((4, NWC), lambda b: (0, 0)),                    # per-lane params
            pl.BlockSpec((D, tb, NL1 + 1), lambda b: (0, b, 0)),         # ball series
            pl.BlockSpec((D, tb, (NL1 + 1) * N), lambda b: (0, b, 0)),   # (t,agent) flat
            pl.BlockSpec((D, tb, NWC), lambda b: (0, b, 0)),             # pair operand A
            pl.BlockSpec((D, tb, NWC), lambda b: (0, b, 0)),             # pair operand B
        ],
        out_specs=pl.BlockSpec((tb, OUTW), lambda b: (b, 0)),
        compiler_params=pltpu.CompilerParams(
            dimension_semantics=("parallel",)),
    )(params, vparams, stb, stf, pa, pb)
    # Kernel output columns are already [BallTouched | Moving | WithBall | Close]
    # in the module's order — no wrapper-side take / concat needed.
    return out


def primitives_reference(states, params):
    """Pure-JAX reference mirroring the PyTorch forward (for verification)."""
    B, L, N, D = states.shape
    NL1 = (L - 2 - 4 + 1) // 3
    NL2 = NL1 - 2
    (a_bt, ieb_bt, a_mb, ieb_mb, a_mp, ieb_mp,
     a_wb, ieb_wb, a_cl, ieb_cl) = [params[i] for i in range(10)]
    sig = lambda z: 1.0 / (1.0 + jnp.exp(-z))

    s = states[:, 1:L - 1]
    d1 = s[:, 0:NL1 * 3:3] - s[:, 3:3 + NL1 * 3:3]                 # [B, NL1, N, D]
    d1b = d1[:, :, 0:1]
    d2 = d1b[:, 0:NL2] - d1b[:, 2:2 + NL2]
    bt = sig((jnp.sqrt(jnp.sum(d2 * d2, -1)) - a_bt) * ieb_bt)     # [B, NL2, 1]

    sp = jnp.sqrt(jnp.sum(d1[..., 0:2] ** 2, -1))                  # [B, NL1, N]
    mv = jnp.concatenate([sig((sp[:, :, 0:1] - a_mb) * ieb_mb),
                          sig((sp[:, :, 1:] - a_mp) * ieb_mp)], axis=-1)

    dwb = jnp.sqrt(jnp.sum((states[:, :, 1:] - states[:, :, 0:1]) ** 2, -1))
    wb = sig((a_wb - dwb) * ieb_wb)                                # [B, L, N-1]

    diff = states[:, :, :, None, :] - states[:, :, None, :, :]
    dall = jnp.sqrt(jnp.sum(diff * diff, -1))                      # [B, L, N, N]
    cl_full = sig((a_cl - dall) * ieb_cl).reshape(B, L, N * N)
    idx = jnp.array([p1 * N + p2 for p1 in range(1, N - 1)
                     for p2 in range(p1 + 1, N)], dtype=jnp.int32)
    cl = cl_full[:, :, idx]                                        # [B, L, 66]

    return jnp.concatenate(
        [bt.reshape(B, -1), mv.reshape(B, -1), wb.reshape(B, -1), cl.reshape(B, -1)],
        axis=1)


if __name__ == "__main__":
    # Small shapes consistent with the module defaults: length=17, n_agents=13.
    B, L, N, D = 2, 17, 13, 4

    key = jax.random.PRNGKey(0)
    k_states, k_alpha = jax.random.split(key)
    states = jax.random.normal(k_states, (B, L, N, D), dtype=jnp.float32) * 2.0

    # Deterministic parameter init (mirrors SoftCompare __init__):
    #   alpha ~ N(0, 1) when not given; betas fixed as in Primitives.__init__.
    alphas = jax.random.normal(k_alpha, (5,), dtype=jnp.float32)
    betas = jnp.array([0.0,                 # BallTouched.large.beta (default 0)
                       math.log(0.3),       # Moving.ball_large.beta
                       math.log(0.1),       # Moving.player_large.beta
                       math.log(0.1),       # WithBall.small.beta
                       math.log(0.1)],      # Close.small.beta
                      dtype=jnp.float32)
    # pack as [alpha_0, 1/exp(beta_0), alpha_1, 1/exp(beta_1), ...]
    params = jnp.stack([alphas, jnp.exp(-betas)], axis=1).reshape(-1)

    out = jax.block_until_ready(jax.jit(primitives_pallas)(states, params))
    ref = jax.block_until_ready(primitives_reference(states, params))

    NL1 = (L - 2 - 4 + 1) // 3
    NL2 = NL1 - 2
    feature_length = NL2 + NL1 * N + L * (N - 1) + L * (N - 1) * (N - 2) // 2
    assert out.shape == (B, feature_length), out.shape
    err = float(jnp.max(jnp.abs(out - ref)))
    assert jnp.allclose(out, ref, atol=2e-5, rtol=1e-5), err
    print("KERNEL_OK")
</pallas_src>

<mosaic_0001>
module attributes {stable_mosaic.version = 11 : i64} {
  func.func @_primitives_kernel(%arg0: i32, %arg1: memref<10xf32, #tpu.memory_space<smem>>, %arg2: memref<4x1326xf32, #tpu.memory_space<vmem>>, %arg3: memref<4x2x5xf32, #tpu.memory_space<vmem>>, %arg4: memref<4x2x65xf32, #tpu.memory_space<vmem>>, %arg5: memref<4x2x1326xf32, #tpu.memory_space<vmem>>, %arg6: memref<4x2x1326xf32, #tpu.memory_space<vmem>>, %arg7: memref<2x1380xf32, #tpu.memory_space<vmem>>) attributes {dimension_semantics = [#tpu.dimension_semantics<parallel>], iteration_bounds = array<i64: 1>, scalar_prefetch = 0 : i64, scratch_operands = 0 : i64, tpu.core_type = #tpu.core_type<tc>, window_params = [{transform_indices = @transform_0, window_bounds = array<i64: 10>}, {pipeline_mode = #tpu.pipeline_mode<synchronous>, transform_indices = @transform_1, window_bounds = array<i64: 4, 1326>}, {transform_indices = @transform_2, window_bounds = array<i64: 4, 2, 5>}, {transform_indices = @transform_3, window_bounds = array<i64: 4, 2, 65>}, {transform_indices = @transform_4, window_bounds = array<i64: 4, 2, 1326>}, {transform_indices = @transform_5, window_bounds = array<i64: 4, 2, 1326>}, {transform_indices = @transform_6, window_bounds = array<i64: 2, 1380>}]} {
    %c0 = arith.constant 0 : index
    %0 = memref.load %arg1[%c0] : memref<10xf32, #tpu.memory_space<smem>>
    %c1 = arith.constant 1 : index
    %1 = memref.load %arg1[%c1] : memref<10xf32, #tpu.memory_space<smem>>
    %c0_0 = arith.constant 0 : index
    %c0_1 = arith.constant 0 : index
    %c0_2 = arith.constant 0 : index
    %2 = vector.load %arg3[%c0_0, %c0_1, %c0_2] : memref<4x2x5xf32, #tpu.memory_space<vmem>>, vector<4x2x5xf32>
    %3 = vector.extract_strided_slice %2 {offsets = [0, 0, 0], sizes = [4, 2, 4], strides = [1, 1, 1]} : vector<4x2x5xf32> to vector<4x2x4xf32>
    %4 = vector.extract_strided_slice %2 {offsets = [0, 0, 1], sizes = [4, 2, 4], strides = [1, 1, 1]} : vector<4x2x5xf32> to vector<4x2x4xf32>
    %5 = arith.subf %3, %4 : vector<4x2x4xf32>
    %6 = vector.extract_strided_slice %5 {offsets = [0, 0, 0], sizes = [4, 2, 2], strides = [1, 1, 1]} : vector<4x2x4xf32> to vector<4x2x2xf32>
    %7 = vector.extract_strided_slice %5 {offsets = [0, 0, 2], sizes = [4, 2, 2], strides = [1, 1, 1]} : vector<4x2x4xf32> to vector<4x2x2xf32>
    %8 = arith.subf %6, %7 : vector<4x2x2xf32>
    %9 = arith.mulf %8, %8 : vector<4x2x2xf32>
    %cst = arith.constant dense<0.000000e+00> : vector<2x2xf32>
    %10 = vector.multi_reduction <add>, %9, %cst [0] : vector<4x2x2xf32> to vector<2x2xf32>
    %11 = math.sqrt %10 : vector<2x2xf32>
    %12 = vector.broadcast %0 : f32 to vector<2x2xf32>
    %13 = arith.subf %11, %12 : vector<2x2xf32>
    %14 = vector.broadcast %1 : f32 to vector<2x2xf32>
    %15 = arith.mulf %13, %14 : vector<2x2xf32>
    %cst_3 = arith.constant 5.000000e-01 : f32
    %16 = vector.broadcast %cst_3 : f32 to vector<2x2xf32>
    %17 = arith.mulf %16, %15 : vector<2x2xf32>
    %18 = math.tanh %17 : vector<2x2xf32>
    %cst_4 = arith.constant 1.000000e+00 : f32
    %19 = vector.broadcast %cst_4 : f32 to vector<2x2xf32>
    %20 = arith.addf %18, %19 : vector<2x2xf32>
    %cst_5 = arith.constant 5.000000e-01 : f32
    %21 = vector.broadcast %cst_5 : f32 to vector<2x2xf32>
    %22 = arith.mulf %21, %20 : vector<2x2xf32>
    %c0_6 = arith.constant 0 : index
    %c0_7 = arith.constant 0 : index
    %23 = vector.load %arg7[%c0_6, %c0_7] : memref<2x1380xf32, #tpu.memory_space<vmem>>, vector<2x2xf32>
    tpu.vector_store %arg7[%c0_6, %c0_7], %22 {strides = array<i32>} : memref<2x1380xf32, #tpu.memory_space<vmem>>, vector<2x2xf32>,
    %c0_8 = arith.constant 0 : index
    %c0_9 = arith.constant 0 : index
    %c0_10 = arith.constant 0 : index
    %24 = vector.load %arg4[%c0_8, %c0_9, %c0_10] : memref<4x2x65xf32, #tpu.memory_space<vmem>>, vector<4x2x65xf32>
    %25 = vector.extract_strided_slice %24 {offsets = [0, 0, 0], sizes = [4, 2, 52], strides = [1, 1, 1]} : vector<4x2x65xf32> to vector<4x2x52xf32>
    %26 = vector.extract_strided_slice %24 {offsets = [0, 0, 13], sizes = [4, 2, 52], strides = [1, 1, 1]} : vector<4x2x65xf32> to vector<4x2x52xf32>
    %27 = arith.subf %25, %26 : vector<4x2x52xf32>
    %28 = vector.extract_strided_slice %27 {offsets = [0, 0, 0], sizes = [1, 2, 52], strides = [1, 1, 1]} : vector<4x2x52xf32> to vector<1x2x52xf32>
    %29 = vector.shape_cast %28 : vector<1x2x52xf32> to vector<2x52xf32>
    %30 = vector.extract_strided_slice %27 {offsets = [0, 0, 0], sizes = [1, 2, 52], strides = [1, 1, 1]} : vector<4x2x52xf32> to vector<1x2x52xf32>
    %31 = vector.shape_cast %30 : vector<1x2x52xf32> to vector<2x52xf32>
    %32 = arith.mulf %29, %31 : vector<2x52xf32>
    %33 = vector.extract_strided_slice %27 {offsets = [1, 0, 0], sizes = [1, 2, 52], strides = [1, 1, 1]} : vector<4x2x52xf32> to vector<1x2x52xf32>
    %34 = vector.shape_cast %33 : vector<1x2x52xf32> to vector<2x52xf32>
    %35 = vector.extract_strided_slice %27 {offsets = [1, 0, 0], sizes = [1, 2, 52], strides = [1, 1, 1]} : vector<4x2x52xf32> to vector<1x2x52xf32>
    %36 = vector.shape_cast %35 : vector<1x2x52xf32> to vector<2x52xf32>
    %37 = arith.mulf %34, %36 : vector<2x52xf32>
    %38 = arith.addf %32, %37 : vector<2x52xf32>
    %39 = math.sqrt %38 : vector<2x52xf32>
    %c0_11 = arith.constant 0 : index
    %c0_12 = arith.constant 0 : index
    %40 = vector.load %arg2[%c0_11, %c0_12] : memref<4x1326xf32, #tpu.memory_space<vmem>>, vector<1x52xf32>
    %41 = vector.broadcast %40 : vector<1x52xf32> to vector<2x52xf32>
    %42 = arith.subf %39, %41 : vector<2x52xf32>
    %c1_13 = arith.constant 1 : index
    %c0_14 = arith.constant 0 : index
    %43 = vector.load %arg2[%c1_13, %c0_14] : memref<4x1326xf32, #tpu.memory_space<vmem>>, vector<1x52xf32>
    %44 = vector.broadcast %43 : vector<1x52xf32> to vector<2x52xf32>
    %45 = arith.mulf %42, %44 : vector<2x52xf32>
    %cst_15 = arith.constant 5.000000e-01 : f32
    %46 = vector.broadcast %cst_15 : f32 to vector<2x52xf32>
    %47 = arith.mulf %46, %45 : vector<2x52xf32>
    %48 = math.tanh %47 : vector<2x52xf32>
    %cst_16 = arith.constant 1.000000e+00 : f32
    %49 = vector.broadcast %cst_16 : f32 to vector<2x52xf32>
    %50 = arith.addf %48, %49 : vector<2x52xf32>
    %cst_17 = arith.constant 5.000000e-01 : f32
    %51 = vector.broadcast %cst_17 : f32 to vector<2x52xf32>
    %52 = arith.mulf %51, %50 : vector<2x52xf32>
    %c0_18 = arith.constant 0 : index
    %c2 = arith.constant 2 : index
    %53 = vector.load %arg7[%c0_18, %c2] : memref<2x1380xf32, #tpu.memory_space<vmem>>, vector<2x52xf32>
    tpu.vector_store %arg7[%c0_18, %c2], %52 {strides = array<i32>} : memref<2x1380xf32, #tpu.memory_space<vmem>>, vector<2x52xf32>,
    %c0_19 = arith.constant 0 : index
    %c0_20 = arith.constant 0 : index
    %c0_21 = arith.constant 0 : index
    %54 = vector.load %arg5[%c0_19, %c0_20, %c0_21] : memref<4x2x1326xf32, #tpu.memory_space<vmem>>, vector<4x2x1326xf32>
    %c0_22 = arith.constant 0 : index
    %c0_23 = arith.constant 0 : index
    %c0_24 = arith.constant 0 : index
    %55 = vector.load %arg6[%c0_22, %c0_23, %c0_24] : memref<4x2x1326xf32, #tpu.memory_space<vmem>>, vector<4x2x1326xf32>
    %56 = arith.subf %54, %55 : vector<4x2x1326xf32>
    %57 = arith.mulf %56, %56 : vector<4x2x1326xf32>
    %cst_25 = arith.constant dense<0.000000e+00> : vector<2x1326xf32>
    %58 = vector.multi_reduction <add>, %57, %cst_25 [0] : vector<4x2x1326xf32> to vector<2x1326xf32>
    %59 = math.sqrt %58 : vector<2x1326xf32>
    %c2_26 = arith.constant 2 : index
    %c0_27 = arith.constant 0 : index
    %60 = vector.load %arg2[%c2_26, %c0_27] : memref<4x1326xf32, #tpu.memory_space<vmem>>, vector<1x1326xf32>
    %61 = vector.broadcast %60 : vector<1x1326xf32> to vector<2x1326xf32>
    %62 = arith.subf %61, %59 : vector<2x1326xf32>
    %c3 = arith.constant 3 : index
    %c0_28 = arith.constant 0 : index
    %63 = vector.load %arg2[%c3, %c0_28] : memref<4x1326xf32, #tpu.memory_space<vmem>>, vector<1x1326xf32>
    %64 = vector.broadcast %63 : vector<1x1326xf32> to vector<2x1326xf32>
    %65 = arith.mulf %62, %64 : vector<2x1326xf32>
    %cst_29 = arith.constant 5.000000e-01 : f32
    %66 = vector.broadcast %cst_29 : f32 to vector<2x1326xf32>
    %67 = arith.mulf %66, %65 : vector<2x1326xf32>
    %68 = math.tanh %67 : vector<2x1326xf32>
    %cst_30 = arith.constant 1.000000e+00 : f32
    %69 = vector.broadcast %cst_30 : f32 to vector<2x1326xf32>
    %70 = arith.addf %68, %69 : vector<2x1326xf32>
    %cst_31 = arith.constant 5.000000e-01 : f32
    %71 = vector.broadcast %cst_31 : f32 to vector<2x1326xf32>
    %72 = arith.mulf %71, %70 : vector<2x1326xf32>
    %c0_32 = arith.constant 0 : index
    %c54 = arith.constant 54 : index
    %73 = vector.load %arg7[%c0_32, %c54] : memref<2x1380xf32, #tpu.memory_space<vmem>>, vector<2x1326xf32>
    tpu.vector_store %arg7[%c0_32, %c54], %72 {strides = array<i32>} : memref<2x1380xf32, #tpu.memory_space<vmem>>, vector<2x1326xf32>,
    return
  }
  func.func @transform_0(%arg0: i32) -> i32 {
    %c0_i32 = arith.constant 0 : i32
    %c0_i32_0 = arith.constant 0 : i32
    return %c0_i32 : i32
  }
  func.func @transform_1(%arg0: i32) -> (i32, i32) {
    %c0_i32 = arith.constant 0 : i32
    %c0_i32_0 = arith.constant 0 : i32
    %c0_i32_1 = arith.constant 0 : i32
    return %c0_i32, %c0_i32_0 : i32, i32
  }
  func.func @transform_2(%arg0: i32) -> (i32, i32, i32) {
    %c0_i32 = arith.constant 0 : i32
    %c0_i32_0 = arith.constant 0 : i32
    %c0_i32_1 = arith.constant 0 : i32
    return %c0_i32, %arg0, %c0_i32_0 : i32, i32, i32
  }
  func.func @transform_3(%arg0: i32) -> (i32, i32, i32) {
    %c0_i32 = arith.constant 0 : i32
    %c0_i32_0 = arith.constant 0 : i32
    %c0_i32_1 = arith.constant 0 : i32
    return %c0_i32, %arg0, %c0_i32_0 : i32, i32, i32
  }
  func.func @transform_4(%arg0: i32) -> (i32, i32, i32) {
    %c0_i32 = arith.constant 0 : i32
    %c0_i32_0 = arith.constant 0 : i32
    %c0_i32_1 = arith.constant 0 : i32
    return %c0_i32, %arg0, %c0_i32_0 : i32, i32, i32
  }
  func.func @transform_5(%arg0: i32) -> (i32, i32, i32) {
    %c0_i32 = arith.constant 0 : i32
    %c0_i32_0 = arith.constant 0 : i32
    %c0_i32_1 = arith.constant 0 : i32
    return %c0_i32, %arg0, %c0_i32_0 : i32, i32, i32
  }
  func.func @transform_6(%arg0: i32) -> (i32, i32) {
    %c0_i32 = arith.constant 0 : i32
    %c0_i32_0 = arith.constant 0 : i32
    return %arg0, %c0_i32 : i32, i32
  }
}

</mosaic_0001>

<bundles_post_ra>
// kernel: primitives_pallas.1
= control target key start
LH: loop header
LB: loop body
LE: loop exit
PB: predicated region body
PF: predicated region fallthrough
CT: control target
= control target key end

     0   :  { %11 = vsyncpa [#allocation4], 0  ;;  %s1500_s0 = inlined_call_operand.vmem [shape: f32[10], index: 0, kind: input, shape index: {}]   ;;  %s1501_s1 = inlined_call_operand.vmem [shape: f32[4,1326], index: 1, kind: input, shape index: {}]   ;;  %s1502_s2 = inlined_call_operand.vmem [shape: f32[4,2,5], index: 2, kind: input, shape index: {}]   ;;  %s1503_s3 = inlined_call_operand.vmem [shape: f32[4,2,65], index: 3, kind: input, shape index: {}]   ;;  %s1504_s4 = inlined_call_operand.vmem [shape: f32[4,2,1326], index: 4, kind: input, shape index: {}]   ;;  %s1505_s5 = inlined_call_operand.vmem [shape: f32[4,2,1326], index: 5, kind: input, shape index: {}]   ;;  %s1506_s6 = inlined_call_operand.hbm [shape: f32[2,1380], index: 6, kind: output, shape index: {}]  }
   0x1   :  { %12 = vsyncpa [#allocation3], 0  ;;  %s19_s23 = sshll.u32 %s1500_s0, 4  ;;  %s20_s23 = int_to_ptr.vmem [resolvable:$true] %s19_s23 }
   0x2   :  { %s984_s24 = scalar_lea.vmem %s20_s23, 16  ;;  %p989_p1 = scmp.lt.s32.totalorder %s20_s23, %s20_s23 }
   0x3   :  { %p985_p0 = scmp.ne.s32.totalorder %s20_s23, %s984_s24  ;;  %p990_p2 = scmp.lt.s32.totalorder %s984_s24, %s984_s24 }
   0x5   :  { %p991_p3 = por %p990_p2, %p989_p1 }
   0x7   :  { %p992_p4 = pnand %p991_p3, %p985_p0 }
   0x9   :  { %995 = shalt.err (!%p992_p4)
}
   0xa   :  { %s1022_s25 = smov [#allocation2]  }
   0xb   :  { %22 = dma.vmem_to_smem %s20_s23, 16, %s1022_s25, [#allocation4]  }
   0xc   :  { %1018 = dma.done.wait [#allocation4], 16  }
   0xd   :  { %1019 = vsyncadd [#allocation4], 4294967280 }
   0xe   :  { %36 = sfence }
   0xf   :  { %v1071_v0 = vld [vmem:[%s1502_s2 + $0x4] sm:$0x3]  ;;  %v1076_v1 = vld [vmem:[%s1502_s2] sm:$0x3]  ;;  %v153_v2 = vlaneseq  ;;  %s1023_s29 = smov 127   ;;  %v165_v9 = vld [vmem:[%s1504_s4 + $0x16] sm:$0xff] }
  0x10   :  { %51 = vrot.lane.b32.xlu1 %v1071_v0, %s1023_s29  ;;  %47 = vrot.lane.b32.xlu0 %v1076_v1, %s1023_s29  ;;  %v1083_v3 = vld [vmem:[%s1502_s2 + $0x6] sm:$0x3]  ;;  %v1088_v4 = vld [vmem:[%s1502_s2 + $0x2] sm:$0x3]  ;;  %v1024_v5 = vmov 1983009808  }
  0x11   :  { %v151_v6 = vunpack.c.l.s4 %v1024_v5  ;;  %v1090_v7 = vshrl.u32 %v153_v2, 7  ;;  %v162_v8 = vld [vmem:[%s1504_s4] sm:$0xff]  ;;  %v168_v10 = vld [vmem:[%s1504_s4 + $0x2c] sm:$0xff]  ;;  %v177_v12 = vld [vmem:[%s1505_s5 + $0x16] sm:$0xff]  ;;  %s1025_s0 = smov 115   ;;  %vm466_vm0 = vcmask 1041408  }
  0x12   :  { %v174_v11 = vld [vmem:[%s1505_s5] sm:$0xff]  ;;  %v180_v15 = vld [vmem:[%s1505_s5 + $0x2c] sm:$0xff]  ;;  %v189_v17 = vsub.f32 %v165_v9, %v177_v12  ;;  %v169_v9 = vld [vmem:[%s1504_s4 + $0x34] sm:$0xff]  ;;  %vm537_vm11 = vcmask 369664   ;;  %s1026_s15 = smov 126   ;;  %s1027_s16 = smov 54  }
  0x13   :  { %v1112_v13 = vld [vmem:[%s1503_s3 + $0x2] sm:$0x3]  ;;  %v152_v14 = vunpack.c.0.s8 %v151_v6  ;;  %v186_v16 = vsub.f32 %v162_v8, %v174_v11  ;;  %v1120_v18 = vld [vmem:[%s1503_s3] sm:$0x3]  ;;  %v192_v21 = vsub.f32 %v168_v10, %v180_v15  ;;  %v163_v59 = vld [vmem:[%s1504_s4 + $0x8] sm:$0xff]  ;;  %s1028_s20 = smov 2  }
  0x14   :  { %53 = vrot.lane.b32.xlu1 %v1083_v3, %s1023_s29  ;;  %49 = vrot.lane.b32.xlu0 %v1088_v4, %s1023_s29  ;;  %v171_v19 = vld [vmem:[%s1504_s4 + $0x42] sm:$0xff]  ;;  %v201_v24 = vmul.f32 %v189_v17, %v189_v17  ;;  %v181_v10 = vld [vmem:[%s1505_s5 + $0x34] sm:$0xff]  ;;  %s917_s21 = sld [smem:[#allocation2 + $0x1]]  ;;  %s1029_s22 = smov [#allocation5]  }
  0x15   :  { %v183_v20 = vld [vmem:[%s1505_s5 + $0x42] sm:$0xff]  ;;  %v1129_v22 = vsub.s32 %v152_v14, %v1090_v7  ;;  %v198_v23 = vmul.f32 %v186_v16, %v186_v16  ;;  %v204_v27 = vmul.f32 %v192_v21, %v192_v21  ;;  %v172_v21 = vld [vmem:[%s1504_s4 + $0x4a] sm:$0xff]  ;;  %s908_s23 = sshll.u32 %s1029_s22, 4  ;;  %s909_s23 = int_to_ptr.vmem [resolvable:$true] %s908_s23 }
  0x16   :  { %v195_v25 = vsub.f32 %v171_v19, %v183_v20  ;;  %v272_v29 = vcombine.high %v201_v24, %v201_v24  ;;  %v166_v62 = vld [vmem:[%s1504_s4 + $0x1e] sm:$0xff]  ;;  %v175_v63 = vld [vmem:[%s1505_s5 + $0x8] sm:$0xff]  ;;  %s996_s24 = scalar_lea.vmem %s909_s23, 352  ;;  %p1001_p6 = scmp.lt.s32.totalorder %s909_s23, %s909_s23 }
  0x17   :  { %v229_v26 = vrot.slane %v198_v23, %v1129_v22  ;;  %v222_v28 = vcombine.high %v198_v23, %v198_v23  ;;  %v279_v30 = vrot.slane %v201_v24, %v1129_v22  ;;  %v329_v33 = vrot.slane %v204_v27, %v1129_v22  ;;  %v178_v2 = vld [vmem:[%s1505_s5 + $0x1e] sm:$0xff]  ;;  %v184_v23 = vld [vmem:[%s1505_s5 + $0x4a] sm:$0xff]  ;;  %p997_p5 = scmp.ne.s32.totalorder %s909_s23, %s996_s24  ;;  %p1002_p7 = scmp.lt.s32.totalorder %s996_s24, %s996_s24 }
  0x18   :  { %117 = vrot.lane.b32.xlu1 %v1112_v13, %s1025_s0  ;;  %115 = vrot.lane.b32.xlu0 %v1120_v18, %s1025_s0  ;;  %v207_v34 = vmul.f32 %v195_v25, %v195_v25  ;;  %v286_v36 = vrot.slane %v272_v29, %v1129_v22  ;;  %v322_v37 = vcombine.high %v204_v27, %v204_v27 }
  0x19   :  { %v237_v31 = vcombine.high %v229_v26, %v229_v26  ;;  %v287_v32 = vcombine.high %v279_v30, %v279_v30  ;;  %v236_v35 = vrot.slane %v222_v28, %v1129_v22  ;;  %v467_v38 = vsel %vm466_vm0, %v229_v26, 0.0  ;;  %p1003_p8 = por %p1002_p7, %p1001_p6 }
  0x1a   :  { %v468_v39 = vsel %vm466_vm0, %v279_v30, 0.0  ;;  %v337_v40 = vcombine.high %v329_v33, %v329_v33  ;;  %v379_v41 = vrot.slane %v207_v34, %v1129_v22  ;;  %v288_v45 = vcombine.high %v286_v36, %v286_v36 }
  0x1b   :  { %v474_v42 = vsel %vm466_vm0, %v237_v31, 0.0  ;;  %v475_v43 = vsel %vm466_vm0, %v287_v32, 0.0  ;;  %v238_v44 = vcombine.high %v236_v35, %v236_v35  ;;  %v336_v46 = vrot.slane %v322_v37, %v1129_v22  ;;  %p1004_p9 = pnand %p1003_p8, %p997_p5 }
  0x1c   :  { %v372_v47 = vcombine.high %v207_v34, %v207_v34  ;;  %v469_v48 = vadd.f32 %v468_v39, %v467_v38  ;;  %v470_v49 = vsel %vm466_vm0, %v329_v33, 0.0  ;;  %v476_v50 = vadd.f32 %v475_v43, %v474_v42 }
  0x1d   :  { %v481_v51 = vsel %vm466_vm0, %v236_v35, 0.0  ;;  %v482_v52 = vsel %vm466_vm0, %v286_v36, 0.0  ;;  %v387_v53 = vcombine.high %v379_v41, %v379_v41  ;;  %v477_v54 = vsel %vm466_vm0, %v337_v40, 0.0 }
  0x1e   :  { %v338_v55 = vcombine.high %v336_v46, %v336_v46  ;;  %v386_v56 = vrot.slane %v372_v47, %v1129_v22  ;;  %v488_v57 = vsel %vm466_vm0, %v238_v44, 0.0  ;;  %v489_v58 = vsel %vm466_vm0, %v288_v45, 0.0  ;;  %v1205_v44 = vld [vmem:[%s1501_s1 + $0x2] ss:$4 sm:$0xff] }
  0x1f   :  { %v471_v60 = vadd.f32 %v470_v49, %v469_v48  ;;  %v483_v61 = vadd.f32 %v482_v52, %v481_v51  ;;  %v472_v5 = vsel %vm466_vm0, %v379_v41, 0.0  ;;  %v478_v6 = vadd.f32 %v477_v54, %v476_v50 }
  0x20   :  { %v484_v8 = vsel %vm466_vm0, %v336_v46, 0.0  ;;  %v479_v11 = vsel %vm466_vm0, %v387_v53, 0.0  ;;  %v490_v12 = vadd.f32 %v489_v58, %v488_v57  ;;  %v388_v14 = vcombine.high %v386_v56, %v386_v56 }
  0x21   :  { %v491_v15 = vsel %vm466_vm0, %v338_v55, 0.0  ;;  %v187_v16 = vsub.f32 %v163_v59, %v175_v63  ;;  %v190_v17 = vsub.f32 %v166_v62, %v178_v2  ;;  %v1173_v19 = vadd.f32 %v472_v5, %v471_v60 }
  0x22   :  { %v485_v20 = vadd.f32 %v484_v8, %v483_v61  ;;  %v193_v24 = vsub.f32 %v169_v9, %v181_v10  ;;  %v1181_v25 = vadd.f32 %v479_v11, %v478_v6  ;;  %v486_v26 = vsel %vm466_vm0, %v386_v56, 0.0 }
  0x23   :  { %v492_v27 = vadd.f32 %v491_v15, %v490_v12  ;;  %v199_v28 = vmul.f32 %v187_v16, %v187_v16  ;;  %v493_v29 = vsel %vm466_vm0, %v388_v14, 0.0  ;;  %v196_v30 = vsub.f32 %v172_v21, %v184_v23 }
  0x24   :  { %v202_v31 = vmul.f32 %v190_v17, %v190_v17  ;;  %v1185_v32 = vadd.f32 %v486_v26, %v485_v20  ;;  %932 = vrsqrt.f32 %v1173_v19  ;;  %v205_v33 = vmul.f32 %v193_v24, %v193_v24 }
  0x25   :  { %934 = vrsqrt.f32 %v1181_v25  ;;  %v1189_v34 = vadd.f32 %v493_v29, %v492_v27  ;;  %v239_v35 = vcombine.high %v199_v28, %v199_v28  ;;  %v246_v36 = vrot.slane %v199_v28, %v1129_v22 }
  0x26   :  { %v208_v37 = vmul.f32 %v196_v30, %v196_v30  ;;  %v289_v38 = vcombine.high %v202_v31, %v202_v31  ;;  %v296_v39 = vrot.slane %v202_v31, %v1129_v22  ;;  %936 = vrsqrt.f32 %v1185_v32 }
  0x27   :  { %v339_v40 = vcombine.high %v205_v33, %v205_v33  ;;  %v346_v41 = vrot.slane %v205_v33, %v1129_v22  ;;  %v1196_v42 = vsub.s32 0, %v1090_v7  ;;  %v1199_v43 = vsub.s32 1, %v1090_v7 }
  0x28   :  { %938 = vrsqrt.f32 %v1189_v34  ;;  %v253_v45 = vrot.slane %v239_v35, %v1129_v22  ;;  %v254_v46 = vcombine.high %v246_v36, %v246_v36  ;;  %v495_v47 = vsel %vm466_vm0, %v246_v36, 0.0 }
  0x29   :  { %v303_v48 = vrot.slane %v289_v38, %v1129_v22  ;;  %v304_v49 = vcombine.high %v296_v39, %v296_v39  ;;  %v389_v50 = vcombine.high %v208_v37, %v208_v37  ;;  %v496_v51 = vsel %vm466_vm0, %v296_v39, 0.0 }
  0x2a   :  { %v353_v52 = vrot.slane %v339_v40, %v1129_v22  ;;  %v354_v53 = vcombine.high %v346_v41, %v346_v41  ;;  %v396_v54 = vrot.slane %v208_v37, %v1129_v22  ;;  %v497_v55 = vadd.f32 %v496_v51, %v495_v47 }
  0x2b   :  { %v631_v56 = vrot.slane %v1205_v44, %v1196_v42  ;;  %v635_v57 = vrot.slane %v1205_v44, %v1199_v43  ;;  %v1218_v58 = vsub.s32 2, %v1090_v7  ;;  %v498_v59 = vsel %vm466_vm0, %v346_v41, 0.0 }
  0x2c   :  { %v642_v61 = vsub.s32 3, %v1090_v7  ;;  %v255_v62 = vcombine.high %v253_v45, %v253_v45  ;;  %v499_v63 = vadd.f32 %v498_v59, %v497_v55  ;;  %v502_v2 = vsel %vm466_vm0, %v254_v46, 0.0  ;;  %v1251_v46 = vld [vmem:[%s1501_s1 + $0x3] ss:$4 sm:$0xff] }
  0x2d   :  { %v305_v6 = vcombine.high %v303_v48, %v303_v48  ;;  %v403_v8 = vrot.slane %v389_v50, %v1129_v22  ;;  %v500_v9 = vsel %vm466_vm0, %v396_v54, 0.0  ;;  %v503_v10 = vsel %vm466_vm0, %v304_v49, 0.0  ;;  %v164_v59 = vld [vmem:[%s1504_s4 + $0x10] sm:$0x3f] }
  0x2e   :  { %v933_v60 = vpop.eup %932  ;;  %v355_v11 = vcombine.high %v353_v52, %v353_v52  ;;  %v404_v12 = vcombine.high %v396_v54, %v396_v54  ;;  %v504_v14 = vadd.f32 %v503_v10, %v502_v2  ;;  %v505_v15 = vsel %vm466_vm0, %v354_v53, 0.0 }
  0x2f   :  { %v935_v5 = vpop.eup %934  ;;  %vm547_vm1 = vcmp.eq.f32.partialorder %v1173_v19, inf  ;;  %vm549_vm2 = vcmp.eq.f32.partialorder %v1173_v19, 0.0  ;;  %v509_v16 = vsel %vm466_vm0, %v253_v45, 0.0  ;;  %v510_v17 = vsel %vm466_vm0, %v303_v48, 0.0 }
  0x30   :  { %v937_v20 = vpop.eup %936  ;;  %v546_v21 = vmul.f32 %v933_v60, %v1173_v19  ;;  %v553_v23 = vmul.f32 %v935_v5, %v1181_v25  ;;  %v1233_v24 = vadd.f32 %v500_v9, %v499_v63  ;;  %v511_v26 = vadd.f32 %v510_v17, %v509_v16  ;;  %v176_v60 = vld [vmem:[%s1505_s5 + $0x10] sm:$0x3f] }
  0x31   :  { %v506_v27 = vadd.f32 %v505_v15, %v504_v14  ;;  %v512_v28 = vsel %vm466_vm0, %v353_v52, 0.0  ;;  %v516_v29 = vsel %vm466_vm0, %v255_v62, 0.0  ;;  %v517_v30 = vsel %vm466_vm0, %v305_v6, 0.0  ;;  %v167_v6 = vld [vmem:[%s1504_s4 + $0x26] sm:$0x3f] }
  0x32   :  { %v939_v31 = vpop.eup %938  ;;  %v405_v33 = vcombine.high %v403_v8, %v403_v8  ;;  %v507_v35 = vsel %vm466_vm0, %v404_v12, 0.0  ;;  %v518_v36 = vadd.f32 %v517_v30, %v516_v29  ;;  %v519_v37 = vsel %vm466_vm0, %v355_v11, 0.0  ;;  %v170_v12 = vld [vmem:[%s1504_s4 + $0x3c] sm:$0x3f] }
  0x33   :  { %v550_v38 = vand.u32 2147483648, %v1173_v19  ;;  %vm554_vm3 = vcmp.eq.f32.partialorder %v1181_v25, inf  ;;  %vm556_vm4 = vcmp.eq.f32.partialorder %v1181_v25, 0.0  ;;  %v560_v39 = vmul.f32 %v937_v20, %v1185_v32  ;;  %v182_v14 = vld [vmem:[%s1505_s5 + $0x3c] sm:$0x3f] }
  0x34   :  { %v557_v40 = vand.u32 2147483648, %v1181_v25  ;;  %vm561_vm5 = vcmp.eq.f32.partialorder %v1185_v32, inf  ;;  %v513_v41 = vadd.f32 %v512_v28, %v511_v26  ;;  %940 = vrsqrt.f32 %v1233_v24  ;;  %v185_v26 = vld [vmem:[%s1505_s5 + $0x52] sm:$0x3f] }
  0x35   :  { %v564_v45 = vand.u32 2147483648, %v1185_v32  ;;  %v1253_v47 = vadd.f32 %v507_v35, %v506_v27  ;;  %v514_v48 = vsel %vm466_vm0, %v403_v8, 0.0  ;;  %v520_v49 = vadd.f32 %v519_v37, %v518_v36  ;;  %v179_v8 = vld [vmem:[%s1505_s5 + $0x26] sm:$0x3f] }
  0x36   :  { %v548_v50 = vsel %vm547_vm1, %v1173_v19, %v546_v21  ;;  %v555_v51 = vsel %vm554_vm3, %v1181_v25, %v553_v23  ;;  %v567_v52 = vmul.f32 %v939_v31, %v1189_v34  ;;  %v521_v53 = vsel %vm466_vm0, %v405_v33, 0.0 }
  0x37   :  { %v562_v54 = vsel %vm561_vm5, %v1185_v32, %v560_v39  ;;  %vm563_vm6 = vcmp.eq.f32.partialorder %v1185_v32, 0.0  ;;  %vm568_vm7 = vcmp.eq.f32.partialorder %v1189_v34, inf  ;;  %v639_v55 = vrot.slane %v1205_v44, %v1218_v58 }
  0x38   :  { %v571_v62 = vand.u32 2147483648, %v1189_v34  ;;  %v1277_v63 = vrot.slane %v1205_v44, %v642_v61  ;;  %v703_v2 = vrot.slane %v1251_v46, %v1196_v42  ;;  %v1281_v5 = vadd.f32 %v514_v48, %v513_v41 }
  0x39   :  { %v551_v9 = vsel %vm549_vm2, %v550_v38, %v548_v50  ;;  %v558_v10 = vsel %vm556_vm4, %v557_v40, %v555_v51  ;;  %v1293_v11 = vadd.f32 %v521_v53, %v520_v49  ;;  %942 = vrsqrt.f32 %v1253_v47 }
  0x3a   :  { %v565_v15 = vsel %vm563_vm6, %v564_v45, %v562_v54  ;;  %v569_v19 = vsel %vm568_vm7, %v1189_v34, %v567_v52  ;;  %vm570_vm8 = vcmp.eq.f32.partialorder %v1189_v34, 0.0  ;;  %v188_v25 = vsub.f32 %v164_v59, %v176_v60  ;;  %v173_v34 = vld [vmem:[%s1504_s4 + $0x52] sm:$0x3f] }
  0x3b   :  { %v707_v16 = vrot.slane %v1251_v46, %v1199_v43  ;;  %v646_v17 = vsub.s32 4, %v1090_v7  ;;  %v650_v20 = vsub.s32 5, %v1090_v7  ;;  %v191_v21 = vsub.f32 %v167_v6, %v179_v8 }
  0x3c   :  { %v683_v32 = vsub.f32 %v631_v56, %v551_v9  ;;  %v684_v23 = vsub.f32 %v635_v57, %v558_v10  ;;  %944 = vrsqrt.f32 %v1281_v5  ;;  %v194_v27 = vsub.f32 %v170_v12, %v182_v14 }
  0x3d   :  { %v1325_v28 = vsel %vm570_vm8, %v571_v62, %v569_v19  ;;  %v685_v29 = vsub.f32 %v639_v55, %v565_v15  ;;  %v711_v56 = vrot.slane %v1251_v46, %v1218_v58  ;;  %946 = vrsqrt.f32 %v1293_v11 }
  0x3e   :  { %v941_v57 = vpop.eup %940  ;;  %v1333_v30 = vrot.slane %v1251_v46, %v642_v61  ;;  %v654_v31 = vsub.s32 6, %v1090_v7  ;;  %v658_v33 = vsub.s32 7, %v1090_v7  ;;  %v200_v35 = vmul.f32 %v188_v25, %v188_v25 }
  0x3f   :  { %v1340_v36 = vrot.slane %v1205_v44, %v646_v17  ;;  %v1345_v37 = vrot.slane %v1205_v44, %v650_v20  ;;  %v197_v38 = vsub.f32 %v173_v34, %v185_v26  ;;  %v203_v39 = vmul.f32 %v191_v21, %v191_v21 }
  0x40   :  { %v686_v61 = vsub.f32 %v1277_v63, %v1325_v28  ;;  %v1349_v40 = vmul.f32 %v703_v2, %v683_v32  ;;  %v1351_v41 = vmul.f32 %v707_v16, %v684_v23  ;;  %v206_v45 = vmul.f32 %v194_v27, %v194_v27 }
  0x41   :  { %v1353_v48 = vmul.f32 %v711_v56, %v685_v29  ;;  %v574_v49 = vmul.f32 %v941_v57, %v1233_v24  ;;  %vm575_vm9 = vcmp.eq.f32.partialorder %v1233_v24, inf  ;;  %vm577_vm10 = vcmp.eq.f32.partialorder %v1233_v24, 0.0 }
  0x42   :  { %v578_v50 = vand.u32 2147483648, %v1233_v24  ;;  %vm582_vm12 = vcmp.eq.f32.partialorder %v1253_v47, inf  ;;  %v585_v51 = vand.u32 2147483648, %v1253_v47  ;;  %v263_v52 = vrot.slane %v200_v35, %v1129_v22 }
  0x43   :  { %v943_v53 = vpop.eup %942  ;;  %vm589_vm13 = vcmp.eq.f32.partialorder %v1281_v5, inf  ;;  %v1366_v54 = vrot.slane %v1205_v44, %v654_v31  ;;  %v209_v55 = vmul.f32 %v197_v38, %v197_v38  ;;  %v313_v59 = vrot.slane %v203_v39, %v1129_v22 }
  0x44   :  { %vm584_vm14 = vcmp.eq.f32.partialorder %v1253_v47, 0.0  ;;  %v592_v60 = vand.u32 2147483648, %v1281_v5  ;;  %v1374_v62 = vrot.slane %v1205_v44, %v658_v33  ;;  %v256_v2 = vcombine.high %v200_v35, %v200_v35 }
  0x45   :  { %v363_v6 = vrot.slane %v206_v45, %v1129_v22  ;;  %v576_v8 = vsel %vm575_vm9, %v1233_v24, %v574_v49  ;;  %vm591_vm15 = vcmp.eq.f32.partialorder %v1281_v5, 0.0  ;;  %vm596_vm1 = vcmp.eq.f32.partialorder %v1293_v11, inf }
  0x46   :  { %v306_v9 = vcombine.high %v203_v39, %v203_v39  ;;  %v356_v10 = vcombine.high %v206_v45, %v206_v45  ;;  %v945_v12 = vpop.eup %944  ;;  %v581_v14 = vmul.f32 %v943_v53, %v1253_v47  ;;  %vm598_vm2 = vcmp.eq.f32.partialorder %v1293_v11, 0.0 }
  0x47   :  { %v599_v44 = vand.u32 2147483648, %v1293_v11  ;;  %v271_v15 = vcombine.high %v263_v52, %v263_v52  ;;  %v947_v19 = vpop.eup %946  ;;  %v321_v25 = vcombine.high %v313_v59, %v313_v59  ;;  %v371_v16 = vcombine.high %v363_v6, %v363_v6 }
  0x48   :  { %v406_v21 = vcombine.high %v209_v55, %v209_v55  ;;  %v413_v32 = vrot.slane %v209_v55, %v1129_v22  ;;  %v579_v23 = vsel %vm577_vm10, %v578_v50, %v576_v8  ;;  %v270_v34 = vrot.slane %v256_v2, %v1129_v22 }
  0x49   :  { %v523_v26 = vsel %vm466_vm0, %v263_v52, 0.0  ;;  %v524_v27 = vsel %vm466_vm0, %v313_v59, 0.0  ;;  %v588_v29 = vmul.f32 %v945_v12, %v1281_v5  ;;  %v320_v56 = vrot.slane %v306_v9, %v1129_v22 }
  0x4a   :  { %v370_v57 = vrot.slane %v356_v10, %v1129_v22  ;;  %v421_v35 = vcombine.high %v413_v32, %v413_v32  ;;  %v595_v38 = vmul.f32 %v947_v19, %v1293_v11  ;;  %v525_v39 = vadd.f32 %v524_v27, %v523_v26 }
  0x4b   :  { %v526_v45 = vsel %vm466_vm0, %v363_v6, 0.0  ;;  %v530_v24 = vsel %vm466_vm0, %v271_v15, 0.0  ;;  %v420_v49 = vrot.slane %v406_v21, %v1129_v22  ;;  %v528_v50 = vsel %vm466_vm0, %v413_v32, 0.0 }
  0x4c   :  { %v531_v52 = vsel %vm466_vm0, %v321_v25, 0.0  ;;  %v533_v53 = vsel %vm466_vm0, %v371_v16, 0.0  ;;  %v583_v55 = vsel %vm582_vm12, %v1253_v47, %v581_v14  ;;  %v527_v59 = vadd.f32 %v526_v45, %v525_v39 }
  0x4d   :  { %v532_v2 = vadd.f32 %v531_v52, %v530_v24  ;;  %v538_v8 = vsel %vm537_vm11, %v270_v34, 0.0  ;;  %v590_v6 = vsel %vm589_vm13, %v1281_v5, %v588_v29  ;;  %v535_v9 = vsel %vm466_vm0, %v421_v35, 0.0 }
  0x4e   :  { %v539_v10 = vsel %vm537_vm11, %v320_v56, 0.0  ;;  %v541_v12 = vsel %vm537_vm11, %v370_v57, 0.0  ;;  %v597_v15 = vsel %vm596_vm1, %v1293_v11, %v595_v38  ;;  %v529_v19 = vadd.f32 %v528_v50, %v527_v59 }
  0x4f   :  { %v534_v14 = vadd.f32 %v533_v53, %v532_v2  ;;  %v540_v25 = vadd.f32 %v539_v10, %v538_v8  ;;  %v586_v16 = vsel %vm584_vm14, %v585_v51, %v583_v55  ;;  %v687_v21 = vsub.f32 %v1340_v36, %v579_v23 }
  0x50   :  { %v719_v32 = vrot.slane %v1251_v46, %v646_v17  ;;  %v543_v34 = vsel %vm537_vm11, %v420_v49, 0.0  ;;  %v593_v26 = vsel %vm591_vm15, %v592_v60, %v590_v6  ;;  %948 = vrsqrt.f32 %v529_v19 }
  0x51   :  { %v536_v27 = vadd.f32 %v535_v9, %v534_v14  ;;  %v542_v29 = vadd.f32 %v541_v12, %v540_v25  ;;  %v758_v47 = vmul.f32 %v1333_v30, %v686_v61  ;;  %v766_v51 = vmul.f32 0.5, %v1349_v40  ;;  %v921_v40 = vld [vmem:[%s1501_s1 + $0x22] ss:$4 sm:$0x7] }
  0x52   :  { %v600_v36 = vsel %vm598_vm2, %v599_v44, %v597_v15  ;;  %v688_v17 = vsub.f32 %v1345_v37, %v586_v16  ;;  %v723_v5 = vrot.slane %v1251_v46, %v650_v20  ;;  %v767_v23 = vmul.f32 0.5, %v1351_v41  ;;  %v923_v44 = vld [vmem:[%s1501_s1 + $0x23] ss:$4 sm:$0x7] }
  0x53   :  { %v544_v60 = vadd.f32 %v543_v34, %v542_v29  ;;  %950 = vrsqrt.f32 %v536_v27  ;;  %v689_v56 = vsub.f32 %v1366_v54, %v593_v26  ;;  %v727_v63 = vrot.slane %v1251_v46, %v654_v31 }
  0x54   :  { %v759_v28 = vmul.f32 %v719_v32, %v687_v21  ;;  %v768_v11 = vmul.f32 0.5, %v1353_v48  ;;  %v690_v30 = vsub.f32 %v1374_v62, %v600_v36  ;;  %v731_v37 = vrot.slane %v1251_v46, %v658_v33 }
  0x55   :  { %952 = vrsqrt.f32 %v544_v60  ;;  %v769_v20 = vmul.f32 0.5, %v758_v47  ;;  %v760_v61 = vmul.f32 %v723_v5, %v688_v17  ;;  %v761_v41 = vmul.f32 %v727_v63, %v689_v56 }
  0x56   :  { %954 = vtanh.f32 %v766_v51  ;;  %v770_v31 = vmul.f32 0.5, %v759_v28  ;;  %v762_v54 = vmul.f32 %v731_v37, %v690_v30  ;;  %v663_v48 = vrot.slane %v921_v40, %v1196_v42 }
  0x57   :  { %956 = vtanh.f32 %v767_v23  ;;  %v771_v7 = vmul.f32 0.5, %v760_v61  ;;  %vm603_vm3 = vcmp.eq.f32.partialorder %v529_v19, inf  ;;  %v606_v46 = vand.u32 2147483648, %v529_v19 }
  0x58   :  { %958 = vtanh.f32 %v768_v11  ;;  %v667_v33 = vrot.slane %v921_v40, %v1199_v43  ;;  %v772_v57 = vmul.f32 0.5, %v761_v41  ;;  %vm605_vm4 = vcmp.eq.f32.partialorder %v529_v19, 0.0 }
  0x59   :  { %960 = vtanh.f32 %v769_v20  ;;  %v773_v39 = vmul.f32 0.5, %v762_v54  ;;  %vm610_vm5 = vcmp.eq.f32.partialorder %v536_v27, inf  ;;  %v613_v45 = vand.u32 2147483648, %v536_v27 }
  0x5a   :  { %v949_v62 = vpop.eup %948  ;;  %962 = vtanh.f32 %v770_v31  ;;  %v671_v24 = vrot.slane %v921_v40, %v1218_v58  ;;  %vm612_vm6 = vcmp.eq.f32.partialorder %v536_v27, 0.0  ;;  %v735_v52 = vrot.slane %v923_v44, %v1196_v42 }
  0x5b   :  { %v602_v35 = vmul.f32 %v949_v62, %v529_v19  ;;  %vm617_vm7 = vcmp.eq.f32.partialorder %v544_v60, inf  ;;  %v620_v59 = vand.u32 2147483648, %v544_v60  ;;  %v739_v2 = vrot.slane %v923_v44, %v1199_v43 }
  0x5c   :  { %vm619_vm8 = vcmp.eq.f32.partialorder %v544_v60, 0.0  ;;  %964 = vtanh.f32 %v771_v7  ;;  %v743_v25 = vrot.slane %v923_v44, %v1218_v58  ;;  %vm87_vm11 = vcmask 9216  }
  0x5d   :  { %v951_v38 = vpop.eup %950  ;;  %v604_v49 = vsel %vm603_vm3, %v529_v19, %v602_v35  ;;  %966 = vtanh.f32 %v772_v57  ;;  %vm890_vm12 = vcmask 1043458   ;;  %vm899_vm14 = vcmask 816132  }
  0x5e   :  { %v609_v50 = vmul.f32 %v951_v38, %v536_v27  ;;  %v607_v55 = vsel %vm605_vm4, %v606_v46, %v604_v49  ;;  %968 = vtanh.f32 %v773_v39  ;;  %vm898_vm13 = vmor %vm890_vm12, %vm466_vm0  ;;  %vm880_vm1 = vcmask 441344  }
  0x5f   :  { %v953_v53 = vpop.eup %952  ;;  %v691_v9 = vsub.f32 %v663_v48, %v607_v55  ;;  %vm900_vm15 = vmor %vm899_vm14, %vm898_vm13 }
  0x60   :  { %v611_v8 = vsel %vm610_vm5, %v536_v27, %v609_v50  ;;  %v616_v6 = vmul.f32 %v953_v53, %v544_v60  ;;  %v955_v10 = vpop.eup %954  ;;  %vm892_vm5 = vcmask 1045508  }
  0x61   :  { %v614_v12 = vsel %vm612_vm6, %v613_v45, %v611_v8  ;;  %v957_v15 = vpop.eup %956  ;;  %v763_v16 = vmul.f32 %v735_v52, %v691_v9  ;;  %v788_v17 = vadd.f32 1.0, %v955_v10 }
  0x62   :  { %v618_v14 = vsel %vm617_vm7, %v544_v60, %v616_v6  ;;  %v692_v19 = vsub.f32 %v667_v33, %v614_v12  ;;  %v959_v42 = vpop.eup %958  ;;  %v789_v5 = vadd.f32 1.0, %v957_v15  ;;  %vm894_vm7 = vcmask 1047558  }
  0x63   :  { %v621_v21 = vsel %vm619_vm8, %v620_v59, %v618_v14  ;;  %v961_v32 = vpop.eup %960  ;;  %v774_v26 = vmul.f32 0.5, %v763_v16  ;;  %v790_v23 = vadd.f32 1.0, %v959_v42  ;;  %v799_v28 = vmul.f32 0.5, %v788_v17 }
  0x64   :  { %v693_v34 = vsub.f32 %v671_v24, %v621_v21  ;;  %v764_v43 = vmul.f32 %v739_v2, %v692_v19  ;;  %v963_v27 = vpop.eup %962  ;;  %v791_v56 = vadd.f32 1.0, %v961_v32  ;;  %v800_v11 = vmul.f32 0.5, %v789_v5 }
  0x65   :  { %970 = vtanh.f32 %v774_v26  ;;  %v792_v30 = vadd.f32 1.0, %v963_v27  ;;  %v801_v41 = vmul.f32 0.5, %v790_v23  ;;  %vm160_vm8 = vcmask 435216  }
  0x66   :  { %v765_v29 = vmul.f32 %v743_v25, %v693_v34  ;;  %v775_v47 = vmul.f32 0.5, %v764_v43  ;;  %v965_v36 = vpop.eup %964  ;;  %v802_v31 = vmul.f32 0.5, %v791_v56  ;;  %v821_v7 = vcombine.low %v799_v28, %v800_v11 }
  0x67   :  { %v967_v58 = vpop.eup %966  ;;  %v793_v37 = vadd.f32 1.0, %v965_v36  ;;  %v803_v46 = vmul.f32 0.5, %v792_v30  ;;  %v919_v36 = vld [vmem:[%s1501_s1 + $0x1] ss:$0 sm:$0xff] }
  0x68   :  { %v776_v51 = vmul.f32 0.5, %v765_v29  ;;  %972 = vtanh.f32 %v775_v47  ;;  %v969_v60 = vpop.eup %968  ;;  %v794_v20 = vadd.f32 1.0, %v967_v58  ;;  %v822_v35 = vcombine.low %v801_v41, %v802_v31 }
  0x69   :  { %v795_v61 = vadd.f32 1.0, %v969_v60  ;;  %v804_v33 = vmul.f32 0.5, %v793_v37  ;;  %v829_v55 = vrot.slane %v821_v7, %v1129_v22 }
  0x6a   :  { %974 = vtanh.f32 %v776_v51  ;;  %v805_v44 = vmul.f32 0.5, %v794_v20  ;;  %v836_v59 = vrot.slane %v822_v35, %v1129_v22 }
  0x6b   :  { %v806_v57 = vmul.f32 0.5, %v795_v61  ;;  %v838_v52 = vcombine.low %v803_v46, %v804_v33 }
  0x6c   :  { %v837_v14 = vcombine.low %v829_v55, %v836_v59 }
  0x6d   :  { %v839_v53 = vcombine.low %v805_v44, %v806_v57  ;;  %v846_v15 = vrot.slane %v838_v52, %v1129_v22 }
  0x6f   :  { %v971_v63 = vpop.eup %970 }
  0x70   :  { %v796_v54 = vadd.f32 1.0, %v971_v63 }
  0x72   :  { %v973_v40 = vpop.eup %972  ;;  %v807_v39 = vmul.f32 0.5, %v796_v54 }
  0x73   :  { %v797_v48 = vadd.f32 1.0, %v973_v40 }
  0x74   :  { %v975_v62 = vpop.eup %974 }
  0x75   :  { %v798_v38 = vadd.f32 1.0, %v975_v62  ;;  %v808_v45 = vmul.f32 0.5, %v797_v48 }
  0x77   :  { %v809_v2 = vmul.f32 0.5, %v798_v38  ;;  %v855_v8 = vcombine.low %v807_v39, %v808_v45 }
  0x79   :  { %v862_v19 = vrot.slane %v855_v8, %v1129_v22  ;;  %v869_v25 = vrot.slane %v809_v2, %v1129_v22 }
  0x7b   :  { %v870_v26 = vcombine.low %v862_v19, %v869_v25 }
  0x82   :  { %v52_v24 = vpop.permute.xlu1 %51  ;;  %v48_v49 = vpop.permute.xlu0 %47 }
  0x83   :  { %v59_v50 = vsub.f32 %v1076_v1, %v48_v49  ;;  %v61_v10 = vsub.f32 %v1071_v0, %v52_v24  ;;  %v853_v1 = vrot.slane %v839_v53, %v1129_v22 }
  0x85   :  { %67 = vrot.lane.b32.xlu0 %v59_v50, %s1026_s15 }
  0x86   :  { %v54_v6 = vpop.permute.xlu1 %53  ;;  %v50_v9 = vpop.permute.xlu0 %49 }
  0x87   :  { %v60_v12 = vsub.f32 %v1088_v4, %v50_v9  ;;  %v62_v21 = vsub.f32 %v1083_v3, %v54_v6  ;;  %v854_v4 = vcombine.low %v846_v15, %v853_v1  ;;  %v918_v3 = vld [vmem:[%s1501_s1] ss:$0 sm:$0xff]  ;;  %s37_s1 = sld [smem:[#allocation2]]  ;;  %v104_v15 = vstv %s917_s21 }
  0x89   :  { %71 = vrot.lane.b32.xlu0 %v61_v10, %s1026_s15  ;;  %69 = vrot.lane.b32.xlu1 %v60_v12, %s1026_s15 }
  0x8a   :  { %v118_v16 = vpop.permute.xlu1 %117  ;;  %v116_v42 = vpop.permute.xlu0 %115 }
  0x8b   :  { %v122_v32 = vsub.f32 %v1112_v13, %v118_v16  ;;  %v121_v0 = vsub.f32 %v1120_v18, %v116_v42 }
  0x8d   :  { %v124_v34 = vmul.f32 %v122_v32, %v122_v32  ;;  %v123_v43 = vmul.f32 %v121_v0, %v121_v0  ;;  %73 = vrot.lane.b32.xlu1 %v62_v21, %s1026_s15  ;;  %871 = vrot.lane.b32.xlu0 %v837_v14, %s1027_s16  ;;  %v102_v9 = vstv %s37_s1 }
  0x8f   :  { %v125_v27 = vadd.f32 %v124_v34, %v123_v43 }
  0x91   :  { %976 = vrsqrt.f32 %v125_v27  ;;  %873 = vrot.lane.b32.xlu1 %v854_v4, %s1027_s16  ;;  %875 = vrot.lane.b32.xlu0 %v870_v26, %s1027_s16  ;;  %vm128_vm9 = vcmp.eq.f32.partialorder %v125_v27, inf  ;;  %v131_v51 = vand.u32 2147483648, %v125_v27  ;;  %vm130_vm10 = vcmp.eq.f32.partialorder %v125_v27, 0.0 }
  0x9b   :  { %v977_v29 = vpop.eup %976 }
  0x9c   :  { %v127_v47 = vmul.f32 %v977_v29, %v125_v27 }
  0x9e   :  { %v129_v13 = vsel %vm128_vm9, %v125_v27, %v127_v47 }
  0x9f   :  { %v132_v18 = vsel %vm130_vm10, %v131_v51, %v129_v13 }
  0xa0   :  { %v138_v17 = vsub.f32 %v132_v18, %v918_v3 }
  0xa2   :  { %v144_v5 = vmul.f32 %v919_v36, %v138_v17 }
  0xa4   :  { %v145_v58 = vmul.f32 0.5, %v144_v5 }
  0xa6   :  { %978 = vtanh.f32 %v145_v58 }
  0xb0   :  { %v979_v60 = vpop.eup %978 }
  0xb1   :  { %v147_v23 = vadd.f32 1.0, %v979_v60 }
  0xb3   :  { %v148_v56 = vmul.f32 0.5, %v147_v23 }
  0xb5   :  { %v156_v63 = vrot.slane %v148_v56, %v1129_v22 }
  0xb7   :  { %157 = vrot.lane.b32.xlu1 %v156_v63, %s1028_s20 }
  0xf7   :  { %v68_v28 = vpop.permute.xlu0 %67 }
  0xf8   :  { %v79_v11 = vsub.f32 %v59_v50, %v68_v28 }
  0xfa   :  { %v83_v20 = vmul.f32 %v79_v11, %v79_v11 }
  0xfb   :  { %v70_v30 = vpop.permute.xlu1 %69  ;;  %v72_v37 = vpop.permute.xlu0 %71 }
  0xfc   :  { %v80_v61 = vsub.f32 %v60_v12, %v70_v30  ;;  %v81_v40 = vsub.f32 %v61_v10, %v72_v37  ;;  %v88_v62 = vsel %vm87_vm11, %v83_v20, 0.0 }
  0xfe   :  { %v84_v41 = vmul.f32 %v80_v61, %v80_v61  ;;  %v85_v31 = vmul.f32 %v81_v40, %v81_v40 }
  0xff   :  { %v74_v54 = vpop.permute.xlu1 %73  ;;  %v872_v48 = vpop.permute.xlu0 %871 }
 0x100   :  { %v89_v7 = vsel %vm87_vm11, %v84_v41, 0.0  ;;  %v82_v22 = vsub.f32 %v62_v21, %v74_v54  ;;  %v91_v33 = vsel %vm87_vm11, %v85_v31, 0.0  ;;  %v877_v45 = vrot.slane %v872_v48, 6 }
 0x101   :  { %v90_v46 = vadd.f32 %v89_v7, %v88_v62 }
 0x102   :  { %v86_v44 = vmul.f32 %v82_v22, %v82_v22  ;;  %v881_v32 = vsel %vm880_vm1, %v877_v45, %v872_v48 }
 0x103   :  { %v92_v57 = vadd.f32 %v91_v33, %v90_v46  ;;  %v874_v35 = vpop.permute.xlu1 %873  ;;  %v876_v38 = vpop.permute.xlu0 %875 }
 0x104   :  { %v93_v39 = vsel %vm87_vm11, %v86_v44, 0.0  ;;  %v878_v24 = vrot.slane %v874_v35, 6  ;;  %v879_v49 = vrot.slane %v876_v38, 6 }
 0x105   :  { %v94_v50 = vadd.f32 %v93_v39, %v92_v57 }
 0x106   :  { %v882_v52 = vsel %vm466_vm0, %v877_v45, %v878_v24  ;;  %v884_v53 = vsel %vm466_vm0, %v878_v24, %v879_v49  ;;  %vm889_vm0 = vcmask 1041840  }
 0x107   :  { %980 = vrsqrt.f32 %v94_v50  ;;  %v883_v55 = vsel %vm880_vm1, %v882_v52, %v874_v35  ;;  %v885_v59 = vsel %vm880_vm1, %v884_v53, %v876_v38  ;;  %vm97_vm2 = vcmp.eq.f32.partialorder %v94_v50, inf  ;;  %vm891_vm4 = vmor %vm890_vm12, %vm889_vm0 }
 0x108   :  { %897 = vst [vmem:[#allocation5 + $0x8] sm:$0xff] %v883_v55  ;;  %901 = vst.msk [vmem:[#allocation5 + $0x10] sm:$0x3f] %vm900_vm15, %v885_v59  ;;  %v100_v6 = vand.u32 2147483648, %v94_v50  ;;  %vm99_vm3 = vcmp.eq.f32.partialorder %v94_v50, 0.0 }
 0x109   :  { %vm893_vm6 = vmor %vm892_vm5, %vm891_vm4 }
 0x10a   :  { %vm895_vm9 = vmor %vm894_vm7, %vm893_vm6 }
 0x111   :  { %v981_v2 = vpop.eup %980 }
 0x112   :  { %v96_v8 = vmul.f32 %v981_v2, %v94_v50 }
 0x114   :  { %v98_v10 = vsel %vm97_vm2, %v94_v50, %v96_v8 }
 0x115   :  { %v101_v12 = vsel %vm99_vm3, %v100_v6, %v98_v10 }
 0x116   :  { %v103_v1 = vsub.f32 %v101_v12, %v102_v9 }
 0x118   :  { %v105_v14 = vmul.f32 %v104_v15, %v103_v1 }
 0x11a   :  { %v106_v19 = vmul.f32 0.5, %v105_v14 }
 0x11c   :  { %982 = vtanh.f32 %v106_v19 }
 0x126   :  { %v983_v25 = vpop.eup %982 }
 0x127   :  { %v108_v16 = vadd.f32 1.0, %v983_v25 }
 0x129   :  { %v109_v42 = vmul.f32 0.5, %v108_v16  ;;  %v158_v21 = vpop.permute.xlu1 %157 }
 0x12b   :  { %110 = vst.msk [vmem:[#allocation5] sm:$0x3] %vm87_vm11, %v109_v42 }
 0x12c   :  { %161 = vst.msk [vmem:[#allocation5] sm:$0x3] %vm160_vm8, %v158_v21 }
 0x12d   :  { %896 = vst.msk [vmem:[#allocation5] sm:$0xff] %vm895_vm9, %v881_v32 }
 0x12e   :  { %1007 = shalt.err (!%p1004_p9)
}
 0x12f   :  { %s1008_s27 = scalar_lea.hbm %s1506_s6, 352 }
 0x130   :  { %p1009_p10 = scmp.ne.s32.totalorder %s1506_s6, %s1008_s27  ;;  %p1012_p11 = scmp.lt.u32.totalorder %s1008_s27, %s1506_s6 }
 0x132   :  { %p1014_p12 = pnand %p1012_p11, %p1009_p10 }
 0x134   :  { %1017 = shalt.err (!%p1014_p12)
}
 0x135   :  { %911 = dma.vmem_to_hbm [thread:$0]  %s909_s23, 352, %s1506_s6, [#allocation3]  }
 0x136   :  { %1020 = dma.done.wait [#allocation3], 352  }
 0x137   :  { %1021 = vsyncadd [#allocation3], 4294966944 }
 0x138   :  { %915 = vsyncpa [#allocation3], 1 }
 0x139   :  { %916 = vsyncpa [#allocation4], 1 }

</bundles_post_ra>
